<compile_context>
chip_gen: v7x
topology: tpu7x:2x2x1
jax: 0.10.0
libtpu: 0.0.40
codegen_flags: <defaults>
</compile_context>

<pallas_src>
import jax
import jax.numpy as jnp
from jax.experimental import pallas as pl
from jax.experimental.pallas import tpu as pltpu

EPS = 1e-5


# ----------------------------------------------------------------------------
# Kernel
# ----------------------------------------------------------------------------
def generator_kernel(xy_ref, w1_ref, w2_ref, w3_ref, w4_ref, vec_ref, out_ref):
    B = xy_ref.shape[0]
    inv_n = 1.0 / B

    F1 = w1_ref.shape[1]   # 2*ngf
    F3 = w3_ref.shape[1]   # 4*ngf
    F4 = w4_ref.shape[1]   # image_size**2

    vec = vec_ref[...]     # packed [8, F4] f32 slab of gammas/betas/b4

    def linear_bn_relu(h_in, w_ref, gamma, beta):
        # Linear (bias omitted: exactly cancelled by BN mean subtraction).
        h = jnp.dot(h_in.astype(jnp.bfloat16), w_ref[...],
                    preferred_element_type=jnp.float32)
        # Single-pass training-mode BatchNorm (biased variance).
        mu = jnp.sum(h, axis=0, keepdims=True) * inv_n
        ex2 = jnp.sum(h * h, axis=0, keepdims=True) * inv_n
        var = ex2 - mu * mu
        hn = (h - mu) * jax.lax.rsqrt(var + EPS)
        return jnp.maximum(hn * gamma + beta, 0.0)

    # fused fc1_x/fc1_y (block-diagonal W1) -> BN -> ReLU
    h = linear_bn_relu(xy_ref[...], w1_ref, vec[0:1, :F1], vec[1:2, :F1])
    # fc2 -> BN -> ReLU
    h = linear_bn_relu(h, w2_ref, vec[2:3, :F1], vec[3:4, :F1])
    # fc3 -> BN -> ReLU
    h = linear_bn_relu(h, w3_ref, vec[4:5, :F3], vec[5:6, :F3])
    # fc4 -> tanh (bias kept)
    out = jnp.dot(h.astype(jnp.bfloat16), w4_ref[...],
                  preferred_element_type=jnp.float32) + vec[6:7, :F4]
    out_ref[...] = jnp.tanh(out).astype(out_ref.dtype)


# ----------------------------------------------------------------------------
# Parameter packing (plain JAX, done once)
# ----------------------------------------------------------------------------
def pack_params(params, nz, ngf, num_classes, image_size):
    F1, F3, F4 = 2 * ngf, 4 * ngf, image_size ** 2

    # Block-diagonal fused first-layer weight: [nz+num_classes, 2*ngf].
    w1 = jnp.zeros((nz + num_classes, F1), jnp.float32)
    w1 = w1.at[:nz, :ngf].set(params["w1x"])
    w1 = w1.at[nz:, ngf:].set(params["w1y"])

    def row(v, width):
        r = jnp.zeros((F4,), jnp.float32)
        return r.at[:width].set(jnp.reshape(v, (-1,)))

    vec = jnp.stack([
        row(jnp.concatenate([jnp.reshape(params["g1x"], (-1,)),
                             jnp.reshape(params["g1y"], (-1,))]), F1),
        row(jnp.concatenate([jnp.reshape(params["bt1x"], (-1,)),
                             jnp.reshape(params["bt1y"], (-1,))]), F1),
        row(params["g2"], F1),
        row(params["bt2"], F1),
        row(params["g3"], F3),
        row(params["bt3"], F3),
        row(params["b4"], F4),
        jnp.zeros((F4,), jnp.float32),
    ])  # [8, F4]

    return dict(
        w1=w1.astype(jnp.bfloat16),
        w2=params["w2"].astype(jnp.bfloat16),
        w3=params["w3"].astype(jnp.bfloat16),
        w4=params["w4"].astype(jnp.bfloat16),
        vec=vec,
    )


# ----------------------------------------------------------------------------
# Wrapper
# ----------------------------------------------------------------------------
def generator_forward(x, y, packed):
    """x: [B, nz] f32, y: [B, num_classes] f32 one-hot. Returns [B, image_size**2]."""
    B = x.shape[0]
    xy = jnp.concatenate([x, y], axis=1).astype(jnp.float32)

    in1 = xy.shape[1]
    F1 = packed["w1"].shape[1]
    F3 = packed["w3"].shape[1]
    F4 = packed["w4"].shape[1]

    mm = in1 * F1 + F1 * F1 + F1 * F3 + F3 * F4
    cost = pl.CostEstimate(
        flops=2 * B * mm,
        transcendentals=B * F4 + (F1 + F1 + F3),        # tanh + rsqrt columns
        bytes_accessed=4 * B * (in1 + F4) + 2 * mm + 4 * 8 * F4,
    )

    vmem = pl.BlockSpec(memory_space=pltpu.MemorySpace.VMEM)
    return pl.pallas_call(
        generator_kernel,
        out_shape=jax.ShapeDtypeStruct((B, F4), jnp.float32),
        in_specs=[vmem] * 6,
        out_specs=vmem,
        cost_estimate=cost,
    )(xy, packed["w1"], packed["w2"], packed["w3"], packed["w4"], packed["vec"])


# ----------------------------------------------------------------------------
# Init (mirrors Generator.weight_init(mean=0, std=0.02): Linear W ~ N(0, std),
# Linear b = 0; BatchNorm gamma=1, beta=0 — weight_init only touches nn.Linear).
# ----------------------------------------------------------------------------
def init_params(key, nz, ngf, num_classes, image_size, std=0.02):
    ks = jax.random.split(key, 5)

    def lin(k, fin, fout):
        w = (std * jax.random.normal(k, (fin, fout))).astype(jnp.float32)
        b = jnp.zeros((1, fout), jnp.float32)
        return w, b

    def bn(f):
        return jnp.ones((1, f), jnp.float32), jnp.zeros((1, f), jnp.float32)

    w1x, b1x = lin(ks[0], nz, ngf)
    w1y, b1y = lin(ks[1], num_classes, ngf)
    w2, b2 = lin(ks[2], ngf * 2, ngf * 2)
    w3, b3 = lin(ks[3], ngf * 2, ngf * 4)
    w4, b4 = lin(ks[4], ngf * 4, image_size ** 2)
    g1x, bt1x = bn(ngf)
    g1y, bt1y = bn(ngf)
    g2, bt2 = bn(ngf * 2)
    g3, bt3 = bn(ngf * 4)

    return dict(w1x=w1x, b1x=b1x, g1x=g1x, bt1x=bt1x,
                w1y=w1y, b1y=b1y, g1y=g1y, bt1y=bt1y,
                w2=w2, b2=b2, g2=g2, bt2=bt2,
                w3=w3, b3=b3, g3=g3, bt3=bt3,
                w4=w4, b4=b4)


# ----------------------------------------------------------------------------
# References
# ----------------------------------------------------------------------------
def generator_reference_f32(x, y, p):
    """Faithful PyTorch-semantics reference (f32, training-mode BN, biases)."""
    def lbr(h, w, b, g, bt):
        h = h @ w + b
        mu = jnp.mean(h, axis=0, keepdims=True)
        var = jnp.mean((h - mu) ** 2, axis=0, keepdims=True)
        return jnp.maximum((h - mu) / jnp.sqrt(var + EPS) * g + bt, 0.0)

    xo = lbr(x, p["w1x"], p["b1x"], p["g1x"], p["bt1x"])
    yo = lbr(y, p["w1y"], p["b1y"], p["g1y"], p["bt1y"])
    h = jnp.concatenate([xo, yo], axis=1)
    h = lbr(h, p["w2"], p["b2"], p["g2"], p["bt2"])
    h = lbr(h, p["w3"], p["b3"], p["g3"], p["bt3"])
    return jnp.tanh(h @ p["w4"] + p["b4"])


def generator_reference_kernel_math(x, y, packed):
    """Plain-JAX mirror of the kernel's exact math (bf16 matmuls, 1-pass BN)."""
    xy = jnp.concatenate([x, y], axis=1).astype(jnp.float32)
    B = xy.shape[0]
    vec = packed["vec"]
    F1 = packed["w1"].shape[1]
    F3 = packed["w3"].shape[1]
    F4 = packed["w4"].shape[1]

    def lbr(h, w, g, bt):
        h = jnp.dot(h.astype(jnp.bfloat16), w, preferred_element_type=jnp.float32)
        mu = jnp.sum(h, axis=0, keepdims=True) / B
        ex2 = jnp.sum(h * h, axis=0, keepdims=True) / B
        hn = (h - mu) * jax.lax.rsqrt(ex2 - mu * mu + EPS)
        return jnp.maximum(hn * g + bt, 0.0)

    h = lbr(xy, packed["w1"], vec[0:1, :F1], vec[1:2, :F1])
    h = lbr(h, packed["w2"], vec[2:3, :F1], vec[3:4, :F1])
    h = lbr(h, packed["w3"], vec[4:5, :F3], vec[5:6, :F3])
    out = jnp.dot(h.astype(jnp.bfloat16), packed["w4"],
                  preferred_element_type=jnp.float32) + vec[6:7, :F4]
    return jnp.tanh(out)


# ----------------------------------------------------------------------------
if __name__ == "__main__":
    # Small, MNIST-cGAN-consistent shapes.
    B, nz, ngf, num_classes, image_size = 8, 16, 32, 10, 16

    key = jax.random.PRNGKey(0)
    k_param, k_x, k_lbl = jax.random.split(key, 3)

    params = init_params(k_param, nz, ngf, num_classes, image_size)
    packed = pack_params(params, nz, ngf, num_classes, image_size)

    x = jax.random.normal(k_x, (B, nz), dtype=jnp.float32)         # latent z
    labels = jax.random.randint(k_lbl, (B,), 0, num_classes)
    y = jax.nn.one_hot(labels, num_classes, dtype=jnp.float32)     # class cond.

    out = generator_forward(x, y, packed)
    out = jax.block_until_ready(out)
    assert out.shape == (B, image_size ** 2), out.shape

    # Tight check against an exact mirror of the kernel math.
    ref_exact = generator_reference_kernel_math(x, y, packed)
    err_exact = float(jnp.max(jnp.abs(out - ref_exact)))
    assert err_exact < 2e-3, err_exact

    # Looser check against the faithful f32 PyTorch-semantics reference
    # (bf16 matmul operands introduce small, bounded differences).
    ref_f32 = generator_reference_f32(x, y, params)
    err_f32 = float(jnp.max(jnp.abs(out - ref_f32)))
    assert err_f32 < 7.5e-2, err_f32

    print("KERNEL_OK")
</pallas_src>

<mosaic_0001>
module attributes {stable_mosaic.version = 11 : i64} {
  func.func @generator_kernel(%arg0: memref<8x26xf32, #tpu.memory_space<vmem>>, %arg1: memref<26x64xbf16, #tpu.memory_space<vmem>>, %arg2: memref<64x64xbf16, #tpu.memory_space<vmem>>, %arg3: memref<64x128xbf16, #tpu.memory_space<vmem>>, %arg4: memref<128x256xbf16, #tpu.memory_space<vmem>>, %arg5: memref<8x256xf32, #tpu.memory_space<vmem>>, %arg6: memref<8x256xf32, #tpu.memory_space<vmem>>) attributes {dimension_semantics = [], scalar_prefetch = 0 : i64, scratch_operands = 0 : i64, tpu.core_type = #tpu.core_type<tc>} {
    %c0 = arith.constant 0 : index
    %c0_0 = arith.constant 0 : index
    %0 = vector.load %arg5[%c0, %c0_0] : memref<8x256xf32, #tpu.memory_space<vmem>>, vector<8x256xf32>
    %c0_1 = arith.constant 0 : index
    %c0_2 = arith.constant 0 : index
    %1 = vector.load %arg0[%c0_1, %c0_2] : memref<8x26xf32, #tpu.memory_space<vmem>>, vector<8x26xf32>
    %2 = vector.extract_strided_slice %0 {offsets = [0, 0], sizes = [1, 64], strides = [1, 1]} : vector<8x256xf32> to vector<1x64xf32>
    %3 = vector.extract_strided_slice %0 {offsets = [1, 0], sizes = [1, 64], strides = [1, 1]} : vector<8x256xf32> to vector<1x64xf32>
    %4 = arith.truncf %1 : vector<8x26xf32> to vector<8x26xbf16>
    %c0_3 = arith.constant 0 : index
    %c0_4 = arith.constant 0 : index
    %5 = vector.load %arg1[%c0_3, %c0_4] : memref<26x64xbf16, #tpu.memory_space<vmem>>, vector<26x64xbf16>
    %cst = arith.constant dense<0.000000e+00> : vector<8x64xf32>
    %6 = tpu.matmul %4, %5, %cst {dimension_numbers = #tpu.dot_dimension_numbers<[1], [0], [0], [1], [0, 0, 1, 1], [], []>} : vector<8x26xbf16>, vector<26x64xbf16>, vector<8x64xf32> -> vector<8x64xf32>
    %cst_5 = arith.constant dense<0.000000e+00> : vector<64xf32>
    %7 = vector.multi_reduction <add>, %6, %cst_5 [0] : vector<8x64xf32> to vector<64xf32>
    %8 = vector.shape_cast %7 : vector<64xf32> to vector<1x64xf32>
    %cst_6 = arith.constant 1.250000e-01 : f32
    %9 = vector.broadcast %cst_6 : f32 to vector<1x64xf32>
    %10 = arith.mulf %8, %9 : vector<1x64xf32>
    %11 = arith.mulf %6, %6 : vector<8x64xf32>
    %cst_7 = arith.constant dense<0.000000e+00> : vector<64xf32>
    %12 = vector.multi_reduction <add>, %11, %cst_7 [0] : vector<8x64xf32> to vector<64xf32>
    %13 = vector.shape_cast %12 : vector<64xf32> to vector<1x64xf32>
    %cst_8 = arith.constant 1.250000e-01 : f32
    %14 = vector.broadcast %cst_8 : f32 to vector<1x64xf32>
    %15 = arith.mulf %13, %14 : vector<1x64xf32>
    %16 = arith.mulf %10, %10 : vector<1x64xf32>
    %17 = arith.subf %15, %16 : vector<1x64xf32>
    %18 = vector.broadcast %10 : vector<1x64xf32> to vector<8x64xf32>
    %19 = arith.subf %6, %18 : vector<8x64xf32>
    %cst_9 = arith.constant 9.99999974E-6 : f32
    %20 = vector.broadcast %cst_9 : f32 to vector<1x64xf32>
    %21 = arith.addf %17, %20 : vector<1x64xf32>
    %22 = math.rsqrt %21 : vector<1x64xf32>
    %23 = vector.broadcast %22 : vector<1x64xf32> to vector<8x64xf32>
    %24 = arith.mulf %19, %23 : vector<8x64xf32>
    %25 = vector.broadcast %2 : vector<1x64xf32> to vector<8x64xf32>
    %26 = arith.mulf %24, %25 : vector<8x64xf32>
    %27 = vector.broadcast %3 : vector<1x64xf32> to vector<8x64xf32>
    %28 = arith.addf %26, %27 : vector<8x64xf32>
    %cst_10 = arith.constant 0.000000e+00 : f32
    %29 = vector.broadcast %cst_10 : f32 to vector<8x64xf32>
    %30 = arith.maximumf %28, %29 : vector<8x64xf32>
    %31 = vector.extract_strided_slice %0 {offsets = [2, 0], sizes = [1, 64], strides = [1, 1]} : vector<8x256xf32> to vector<1x64xf32>
    %32 = vector.extract_strided_slice %0 {offsets = [3, 0], sizes = [1, 64], strides = [1, 1]} : vector<8x256xf32> to vector<1x64xf32>
    %33 = arith.truncf %30 : vector<8x64xf32> to vector<8x64xbf16>
    %c0_11 = arith.constant 0 : index
    %c0_12 = arith.constant 0 : index
    %34 = vector.load %arg2[%c0_11, %c0_12] : memref<64x64xbf16, #tpu.memory_space<vmem>>, vector<64x64xbf16>
    %cst_13 = arith.constant dense<0.000000e+00> : vector<8x64xf32>
    %35 = tpu.matmul %33, %34, %cst_13 {dimension_numbers = #tpu.dot_dimension_numbers<[1], [0], [0], [1], [0, 0, 1, 1], [], []>} : vector<8x64xbf16>, vector<64x64xbf16>, vector<8x64xf32> -> vector<8x64xf32>
    %cst_14 = arith.constant dense<0.000000e+00> : vector<64xf32>
    %36 = vector.multi_reduction <add>, %35, %cst_14 [0] : vector<8x64xf32> to vector<64xf32>
    %37 = vector.shape_cast %36 : vector<64xf32> to vector<1x64xf32>
    %cst_15 = arith.constant 1.250000e-01 : f32
    %38 = vector.broadcast %cst_15 : f32 to vector<1x64xf32>
    %39 = arith.mulf %37, %38 : vector<1x64xf32>
    %40 = arith.mulf %35, %35 : vector<8x64xf32>
    %cst_16 = arith.constant dense<0.000000e+00> : vector<64xf32>
    %41 = vector.multi_reduction <add>, %40, %cst_16 [0] : vector<8x64xf32> to vector<64xf32>
    %42 = vector.shape_cast %41 : vector<64xf32> to vector<1x64xf32>
    %cst_17 = arith.constant 1.250000e-01 : f32
    %43 = vector.broadcast %cst_17 : f32 to vector<1x64xf32>
    %44 = arith.mulf %42, %43 : vector<1x64xf32>
    %45 = arith.mulf %39, %39 : vector<1x64xf32>
    %46 = arith.subf %44, %45 : vector<1x64xf32>
    %47 = vector.broadcast %39 : vector<1x64xf32> to vector<8x64xf32>
    %48 = arith.subf %35, %47 : vector<8x64xf32>
    %cst_18 = arith.constant 9.99999974E-6 : f32
    %49 = vector.broadcast %cst_18 : f32 to vector<1x64xf32>
    %50 = arith.addf %46, %49 : vector<1x64xf32>
    %51 = math.rsqrt %50 : vector<1x64xf32>
    %52 = vector.broadcast %51 : vector<1x64xf32> to vector<8x64xf32>
    %53 = arith.mulf %48, %52 : vector<8x64xf32>
    %54 = vector.broadcast %31 : vector<1x64xf32> to vector<8x64xf32>
    %55 = arith.mulf %53, %54 : vector<8x64xf32>
    %56 = vector.broadcast %32 : vector<1x64xf32> to vector<8x64xf32>
    %57 = arith.addf %55, %56 : vector<8x64xf32>
    %cst_19 = arith.constant 0.000000e+00 : f32
    %58 = vector.broadcast %cst_19 : f32 to vector<8x64xf32>
    %59 = arith.maximumf %57, %58 : vector<8x64xf32>
    %60 = vector.extract_strided_slice %0 {offsets = [4, 0], sizes = [1, 128], strides = [1, 1]} : vector<8x256xf32> to vector<1x128xf32>
    %61 = vector.extract_strided_slice %0 {offsets = [5, 0], sizes = [1, 128], strides = [1, 1]} : vector<8x256xf32> to vector<1x128xf32>
    %62 = arith.truncf %59 : vector<8x64xf32> to vector<8x64xbf16>
    %c0_20 = arith.constant 0 : index
    %c0_21 = arith.constant 0 : index
    %63 = vector.load %arg3[%c0_20, %c0_21] : memref<64x128xbf16, #tpu.memory_space<vmem>>, vector<64x128xbf16>
    %cst_22 = arith.constant dense<0.000000e+00> : vector<8x128xf32>
    %64 = tpu.matmul %62, %63, %cst_22 {dimension_numbers = #tpu.dot_dimension_numbers<[1], [0], [0], [1], [0, 0, 1, 1], [], []>} : vector<8x64xbf16>, vector<64x128xbf16>, vector<8x128xf32> -> vector<8x128xf32>
    %cst_23 = arith.constant dense<0.000000e+00> : vector<128xf32>
    %65 = vector.multi_reduction <add>, %64, %cst_23 [0] : vector<8x128xf32> to vector<128xf32>
    %66 = vector.shape_cast %65 : vector<128xf32> to vector<1x128xf32>
    %cst_24 = arith.constant 1.250000e-01 : f32
    %67 = vector.broadcast %cst_24 : f32 to vector<1x128xf32>
    %68 = arith.mulf %66, %67 : vector<1x128xf32>
    %69 = arith.mulf %64, %64 : vector<8x128xf32>
    %cst_25 = arith.constant dense<0.000000e+00> : vector<128xf32>
    %70 = vector.multi_reduction <add>, %69, %cst_25 [0] : vector<8x128xf32> to vector<128xf32>
    %71 = vector.shape_cast %70 : vector<128xf32> to vector<1x128xf32>
    %cst_26 = arith.constant 1.250000e-01 : f32
    %72 = vector.broadcast %cst_26 : f32 to vector<1x128xf32>
    %73 = arith.mulf %71, %72 : vector<1x128xf32>
    %74 = arith.mulf %68, %68 : vector<1x128xf32>
    %75 = arith.subf %73, %74 : vector<1x128xf32>
    %76 = vector.broadcast %68 : vector<1x128xf32> to vector<8x128xf32>
    %77 = arith.subf %64, %76 : vector<8x128xf32>
    %cst_27 = arith.constant 9.99999974E-6 : f32
    %78 = vector.broadcast %cst_27 : f32 to vector<1x128xf32>
    %79 = arith.addf %75, %78 : vector<1x128xf32>
    %80 = math.rsqrt %79 : vector<1x128xf32>
    %81 = vector.broadcast %80 : vector<1x128xf32> to vector<8x128xf32>
    %82 = arith.mulf %77, %81 : vector<8x128xf32>
    %83 = vector.broadcast %60 : vector<1x128xf32> to vector<8x128xf32>
    %84 = arith.mulf %82, %83 : vector<8x128xf32>
    %85 = vector.broadcast %61 : vector<1x128xf32> to vector<8x128xf32>
    %86 = arith.addf %84, %85 : vector<8x128xf32>
    %cst_28 = arith.constant 0.000000e+00 : f32
    %87 = vector.broadcast %cst_28 : f32 to vector<8x128xf32>
    %88 = arith.maximumf %86, %87 : vector<8x128xf32>
    %89 = arith.truncf %88 : vector<8x128xf32> to vector<8x128xbf16>
    %c0_29 = arith.constant 0 : index
    %c0_30 = arith.constant 0 : index
    %90 = vector.load %arg4[%c0_29, %c0_30] : memref<128x256xbf16, #tpu.memory_space<vmem>>, vector<128x256xbf16>
    %cst_31 = arith.constant dense<0.000000e+00> : vector<8x256xf32>
    %91 = tpu.matmul %89, %90, %cst_31 {dimension_numbers = #tpu.dot_dimension_numbers<[1], [0], [0], [1], [0, 0, 1, 1], [], []>} : vector<8x128xbf16>, vector<128x256xbf16>, vector<8x256xf32> -> vector<8x256xf32>
    %92 = vector.extract_strided_slice %0 {offsets = [6, 0], sizes = [1, 256], strides = [1, 1]} : vector<8x256xf32> to vector<1x256xf32>
    %93 = vector.broadcast %92 : vector<1x256xf32> to vector<8x256xf32>
    %94 = arith.addf %91, %93 : vector<8x256xf32>
    %95 = math.tanh %94 : vector<8x256xf32>
    %c0_32 = arith.constant 0 : index
    %c0_33 = arith.constant 0 : index
    %96 = vector.load %arg6[%c0_32, %c0_33] : memref<8x256xf32, #tpu.memory_space<vmem>>, vector<8x256xf32>
    tpu.vector_store %arg6[%c0_32, %c0_33], %95 {strides = array<i32>} : memref<8x256xf32, #tpu.memory_space<vmem>>, vector<8x256xf32>,
    return
  }
}

</mosaic_0001>

<bundles_post_ra>
// kernel: tpu_custom_call.1
= control target key start
LH: loop header
LB: loop body
LE: loop exit
PB: predicated region body
PF: predicated region fallthrough
CT: control target
= control target key end

     0   :  { %11 = vsyncpa [#allocation3], 0  ;;  %s1024_s0 = inlined_call_operand.hbm [shape: f32[8,26], index: 0, kind: input, shape index: {}]   ;;  %s1025_s1 = inlined_call_operand.hbm [shape: bf16[26,64], index: 1, kind: input, shape index: {}]   ;;  %s1026_s2 = inlined_call_operand.hbm [shape: bf16[64,64], index: 2, kind: input, shape index: {}]   ;;  %s1027_s3 = inlined_call_operand.hbm [shape: bf16[64,128], index: 3, kind: input, shape index: {}]   ;;  %s1028_s4 = inlined_call_operand.hbm [shape: bf16[128,256], index: 4, kind: input, shape index: {}]   ;;  %s1029_s5 = inlined_call_operand.vmem [shape: f32[8,256], index: 5, kind: input, shape index: {}]   ;;  %s1030_s6 = inlined_call_operand.hbm [shape: f32[8,256], index: 6, kind: output, shape index: {}]  }
   0x1   :  { %12 = vsyncpa [#allocation6], 0 }
   0x2   :  { %13 = vsyncpa [#allocation9], 0 }
   0x3   :  { %14 = vsyncpa [#allocation4], 0  ;;  %s849_s21 = smov [#allocation5]   ;;  %s709_s25 = scalar_lea.hbm %s1025_s1, 256 }
   0x4   :  { %s30_s22 = sshll.u32 %s849_s21, 4  ;;  %p710_p0 = scmp.ne.s32.totalorder %s1025_s1, %s709_s25  ;;  %s31_s22 = int_to_ptr.vmem [resolvable:$true] %s30_s22 }
   0x5   :  { %p713_p1 = scmp.lt.u32.totalorder %s709_s25, %s1025_s1 }
   0x7   :  { %p715_p2 = pnand %p713_p1, %p710_p0 }
   0x9   :  { %718 = shalt.err (!%p715_p2)
}
   0xa   :  { %s719_s30 = scalar_lea.vmem %s31_s22, 256  ;;  %p724_p4 = scmp.lt.s32.totalorder %s31_s22, %s31_s22 }
   0xb   :  { %p720_p3 = scmp.ne.s32.totalorder %s31_s22, %s719_s30  ;;  %p725_p5 = scmp.lt.s32.totalorder %s719_s30, %s719_s30 }
   0xd   :  { %p726_p6 = por %p725_p5, %p724_p4 }
   0xf   :  { %p727_p7 = pnand %p726_p6, %p720_p3 }
  0x11   :  { %730 = shalt.err (!%p727_p7)
}
  0x12   :  { %s850_s7 = smov 64   ;;  %s851_s8 = smov 4  }
  0x13   :  { %36 = dma.hbm_to_vmem [thread:$0]  %s1025_s1, 256, %s31_s22, [#allocation6], %s850_s7, %s850_s7, %s851_s8  }
  0x14   :  { %s852_s11 = smov [#allocation8]   ;;  %s853_s13 = smov [#allocation2]  }
  0x15   :  { %s54_s12 = sshll.u32 %s852_s11, 4  ;;  %s21_s14 = sshll.u32 %s853_s13, 4  ;;  %s55_s12 = int_to_ptr.vmem [resolvable:$true] %s54_s12  ;;  %s22_s14 = int_to_ptr.vmem [resolvable:$true] %s21_s14 }
  0x16   :  { %s731_s17 = scalar_lea.hbm %s1027_s3, 512 }
  0x17   :  { %p732_p8 = scmp.ne.s32.totalorder %s1027_s3, %s731_s17  ;;  %p735_p9 = scmp.lt.u32.totalorder %s731_s17, %s1027_s3 }
  0x19   :  { %p737_p10 = pnand %p735_p9, %p732_p8 }
  0x1b   :  { %740 = shalt.err (!%p737_p10)
}
  0x1c   :  { %s741_s1 = scalar_lea.vmem %s55_s12, 512  ;;  %p746_p12 = scmp.lt.s32.totalorder %s55_s12, %s55_s12 }
  0x1d   :  { %p742_p11 = scmp.ne.s32.totalorder %s55_s12, %s741_s1  ;;  %p747_p13 = scmp.lt.s32.totalorder %s741_s1, %s741_s1 }
  0x1f   :  { %p748_p0 = por %p747_p13, %p746_p12 }
  0x21   :  { %p749_p1 = pnand %p748_p0, %p742_p11 }
  0x23   :  { %752 = shalt.err (!%p749_p1)
}
  0x24   :  { %60 = dma.hbm_to_vmem [thread:$0]  %s1027_s3, 512, %s55_s12, [#allocation9], %s850_s7, %s850_s7, %s851_s8  }
  0x25   :  { %s753_s26 = scalar_lea.hbm %s1024_s0, 128 }
  0x26   :  { %p754_p2 = scmp.ne.s32.totalorder %s1024_s0, %s753_s26  ;;  %p757_p3 = scmp.lt.u32.totalorder %s753_s26, %s1024_s0 }
  0x28   :  { %p759_p4 = pnand %p757_p3, %p754_p2 }
  0x2a   :  { %762 = shalt.err (!%p759_p4)
}
  0x2b   :  { %s763_s9 = scalar_lea.vmem %s22_s14, 128  ;;  %p768_p6 = scmp.lt.s32.totalorder %s22_s14, %s22_s14 }
  0x2c   :  { %p764_p5 = scmp.ne.s32.totalorder %s22_s14, %s763_s9  ;;  %p769_p7 = scmp.lt.s32.totalorder %s763_s9, %s763_s9 }
  0x2e   :  { %p770_p8 = por %p769_p7, %p768_p6 }
  0x30   :  { %p771_p9 = pnand %p770_p8, %p764_p5 }
  0x32   :  { %774 = shalt.err (!%p771_p9)
}
  0x33   :  { %24 = dma.hbm_to_vmem [thread:$0]  %s1024_s0, 128, %s22_s14, [#allocation3]  }
  0x34   :  { %s854_s11 = smov [#allocation7]   ;;  %s855_s13 = smov [#allocation10]  }
  0x35   :  { %s42_s12 = sshll.u32 %s854_s11, 4  ;;  %s66_s15 = sshll.u32 %s855_s13, 4  ;;  %s43_s12 = int_to_ptr.vmem [resolvable:$true] %s42_s12  ;;  %s67_s15 = int_to_ptr.vmem [resolvable:$true] %s66_s15 }
  0x36   :  { %s775_s18 = scalar_lea.hbm %s1026_s2, 512 }
  0x37   :  { %p776_p10 = scmp.ne.s32.totalorder %s1026_s2, %s775_s18  ;;  %p779_p11 = scmp.lt.u32.totalorder %s775_s18, %s1026_s2 }
  0x39   :  { %p781_p12 = pnand %p779_p11, %p776_p10 }
  0x3b   :  { %784 = shalt.err (!%p781_p12)
}
  0x3c   :  { %s785_s0 = scalar_lea.vmem %s43_s12, 512  ;;  %p790_p0 = scmp.lt.s32.totalorder %s43_s12, %s43_s12 }
  0x3d   :  { %p786_p13 = scmp.ne.s32.totalorder %s43_s12, %s785_s0  ;;  %p791_p1 = scmp.lt.s32.totalorder %s785_s0, %s785_s0 }
  0x3f   :  { %p792_p2 = por %p791_p1, %p790_p0 }
  0x41   :  { %p793_p3 = pnand %p792_p2, %p786_p13 }
  0x43   :  { %796 = shalt.err (!%p793_p3)
}
  0x44   :  { %48 = dma.hbm_to_vmem [thread:$0]  %s1026_s2, 512, %s43_s12, [#allocation6], %s850_s7, %s850_s7, %s851_s8  }
  0x45   :  { %s797_s25 = scalar_lea.hbm %s1028_s4, 2048 }
  0x46   :  { %p798_p4 = scmp.ne.s32.totalorder %s1028_s4, %s797_s25  ;;  %p801_p5 = scmp.lt.u32.totalorder %s797_s25, %s1028_s4 }
  0x48   :  { %p803_p6 = pnand %p801_p5, %p798_p4 }
  0x4a   :  { %806 = shalt.err (!%p803_p6)
}
  0x4b   :  { %s807_s30 = scalar_lea.vmem %s67_s15, 2048  ;;  %p812_p8 = scmp.lt.s32.totalorder %s67_s15, %s67_s15 }
  0x4c   :  { %p808_p7 = scmp.ne.s32.totalorder %s67_s15, %s807_s30  ;;  %p813_p9 = scmp.lt.s32.totalorder %s807_s30, %s807_s30 }
  0x4e   :  { %p814_p10 = por %p813_p9, %p812_p8 }
  0x50   :  { %p815_p11 = pnand %p814_p10, %p808_p7 }
  0x52   :  { %818 = shalt.err (!%p815_p11)
}
  0x53   :  { %s856_s2 = smov 128   ;;  %s857_s7 = smov 8  }
  0x54   :  { %72 = dma.hbm_to_vmem [thread:$0]  %s1028_s4, 2048, %s67_s15, [#allocation9], %s856_s2, %s856_s2, %s857_s7  }
  0x55   :  { %841 = dma.done.wait [#allocation3], 128  }
  0x56   :  { %842 = vsyncadd [#allocation3], 4294967168 }
  0x57   :  { %843 = dma.done.wait [#allocation6], 768  }
  0x58   :  { %844 = vsyncadd [#allocation6], 4294966528 }
  0x59   :  { %845 = dma.done.wait [#allocation9], 2560  }
  0x5a   :  { %846 = vsyncadd [#allocation9], 4294964736  ;;  %v858_v0 = vmov 0.0   ;;  %vm859_vm0 = vmmov 0   ;;  %v665_v1 = vld [vmem:[#allocation5] sm:$0xff]   ;;  %vm114_vm1 = vcmask 1044480   ;;  %v182_v33 = vlaneseq }
  0x5b   :  { %620 = vmatprep.subr.bf16.mxu0 %v858_v0  ;;  %624 = vmatprep.mubr.msk.bf16.mxu0 %vm859_vm0, %v858_v0  ;;  %v666_v2 = vld [vmem:[#allocation5 + $0x8] sm:$0x1f]   ;;  %v93_v3 = vld [vmem:[#allocation2] sm:$0xff]  ;;  %vm110_vm2 = vcmask 211968   ;;  %v667_v6 = vld [vmem:[#allocation7] sm:$0xff]   ;;  %vm158_vm3 = vcmask 523264  }
  0x5c   :  { %621 = vmatpush3.bf16.msra.mxu0 %v665_v1  ;;  %v116_v4 = vsel %vm114_vm1, %v666_v2, 0  ;;  %v94_v5 = vpack.c.bf16 %v93_v3, %v93_v3  ;;  %v668_v7 = vld [vmem:[#allocation7 + $0x8] sm:$0xff]   ;;  %v669_v8 = vld [vmem:[#allocation7 + $0x10] sm:$0xff]   ;;  %v670_v9 = vld [vmem:[#allocation7 + $0x18] sm:$0xff]   ;;  %v979_v35 = vshrl.u32 %v182_v33, 7  ;;  %s861_s12 = smov [#allocation11]  }
  0x5d   :  { %622 = vmatprep.subr.bf16.mxu0 %v858_v0  ;;  %v985_v37 = vld [vmem:[%s1029_s5] sm:$0xff]  ;;  %v671_v48 = vld [vmem:[#allocation8] sm:$0xff]   ;;  %v672_v49 = vld [vmem:[#allocation8 + $0x8] sm:$0xff]   ;;  %s567_s13 = sshll.u32 %s861_s12, 4  ;;  %s568_s13 = int_to_ptr.vmem [resolvable:$true] %s567_s13 }
  0x5e   :  { %v184_v36 = vsub.s32 0, %v979_v35  ;;  %v189_v38 = vsub.s32 1, %v979_v35  ;;  %v673_v50 = vld [vmem:[#allocation8 + $0x10] sm:$0xff]   ;;  %v674_v51 = vld [vmem:[#allocation8 + $0x18] sm:$0xff]   ;;  %s819_s15 = scalar_lea.vmem %s568_s13, 256  ;;  %p824_p13 = scmp.lt.s32.totalorder %s568_s13, %s568_s13 }
  0x5f   :  { %v690_v33 = vld [vmem:[#allocation10 + $0x54] ss:$8 sps:$4 sm:$0xff]   ;;  %p820_p12 = scmp.ne.s32.totalorder %s568_s13, %s819_s15  ;;  %p825_p0 = scmp.lt.s32.totalorder %s819_s15, %s819_s15 }
  0x60   :  { %623 = vmatpush3.bf16.msra.mxu0 %v116_v4  ;;  %v185_v40 = vrot.slane %v985_v37, %v184_v36  ;;  %v190_v43 = vrot.slane %v985_v37, %v189_v38  ;;  %v693_v36 = vld [vmem:[#allocation10 + $0x64] ss:$8 sps:$4 sm:$0xff]   ;;  %v695_v38 = vld [vmem:[#allocation10 + $0x60] ss:$8 sps:$4 sm:$0xff]  }
  0x61   :  { %628 = vmatprep.subr.bf16.mxu0 %v858_v0  ;;  %p826_p1 = por %p825_p0, %p824_p13 }
  0x63   :  { %625 = vmatmul.mubr.msk.bf16.vlgmr.msra.gmra.mrb[0].mxu0 %vm110_vm2, %v94_v5  ;;  %p827_p2 = pnand %p826_p1, %p820_p12 }
  0x64   :  { %636 = vmatprep.mubr.msk.bf16.mxu0 %vm859_vm0, %v858_v0  ;;  %629 = vmatpush3.bf16.msra.mxu0 %v667_v6 }
  0x65   :  { %630 = vmatprep.subr.bf16.mxu0 %v858_v0 }
  0x68   :  { %631 = vmatpush3.bf16.msra.mxu0 %v668_v7 }
  0x69   :  { %632 = vmatprep.subr.bf16.mxu0 %v858_v0 }
  0x6c   :  { %633 = vmatpush3.bf16.msra.mxu0 %v669_v8 }
  0x6d   :  { %634 = vmatprep.subr.bf16.mxu0 %v858_v0 }
  0x70   :  { %635 = vmatpush3.bf16.msra.mxu0 %v670_v9 }
  0x71   :  { %640 = vmatprep.subr.bf16.mxu0 %v858_v0 }
 0x136   :  { %v152_v10 = vpop.f32.mrb[0].mxu0 }
 0x137   :  { %v159_v11 = vsel %vm158_vm3, %v152_v10, 0.0  ;;  %v167_v12 = vmul.f32 %v152_v10, %v152_v10  ;;  %v626_v13 = vpop.f32.mrb[1].mxu0 }
 0x138   :  { %v160_v14 = vrot.slane %v159_v11, 4  ;;  %v155_v15 = vpop.f32.mrb[2].mxu0  ;;  %v299_v13 = vsub.s32 3, %v979_v35 }
 0x139   :  { %v168_v16 = vsel %vm158_vm3, %v167_v12, 0.0  ;;  %v627_v17 = vpop.f32.mrb[3].mxu0  ;;  %v294_v12 = vsub.s32 2, %v979_v35 }
 0x13a   :  { %v161_v18 = vadd.f32 %v160_v14, %v159_v11  ;;  %v169_v19 = vrot.slane %v168_v16, 4 }
 0x13b   :  { %v295_v15 = vrot.slane %v985_v37, %v294_v12  ;;  %v92_v12 = vld [vmem:[%s1029_s5 + $0x8] sm:$0xff] }
 0x13c   :  { %v162_v20 = vrot.slane %v161_v18, 2  ;;  %v170_v21 = vadd.f32 %v169_v19, %v168_v16 }
 0x13e   :  { %v163_v22 = vadd.f32 %v162_v20, %v161_v18  ;;  %v171_v23 = vrot.slane %v170_v21, 2  ;;  %v300_v18 = vrot.slane %v985_v37, %v299_v13 }
 0x140   :  { %v164_v24 = vrot.slane %v163_v22, 1  ;;  %v172_v25 = vadd.f32 %v171_v23, %v170_v21  ;;  %v675_v23 = vld [vmem:[#allocation10 + $0x4] ss:$8 sps:$4 sm:$0xff]  }
 0x141   :  { %516 = vmatprep.subr.bf16.mxu1 %v675_v23 }
 0x142   :  { %v165_v26 = vadd.f32 %v164_v24, %v163_v22  ;;  %v173_v27 = vrot.slane %v172_v25, 1  ;;  %v677_v24 = vld [vmem:[#allocation10] ss:$8 sps:$4 sm:$0xff]  }
 0x143   :  { %517 = vmatpush1.bf16.msra.mxu1 %v677_v24 }
 0x144   :  { %v166_v28 = vmul.f32 0.125, %v165_v26  ;;  %v174_v29 = vadd.f32 %v173_v27, %v172_v25  ;;  %v678_v25 = vld [vmem:[#allocation10 + $0x14] ss:$8 sps:$4 sm:$0xff]   ;;  %v680_v26 = vld [vmem:[#allocation10 + $0x10] ss:$8 sps:$4 sm:$0xff]  }
 0x145   :  { %518 = vmatprep.subr.bf16.mxu1 %v678_v25  ;;  %v681_v27 = vld [vmem:[#allocation10 + $0x24] ss:$8 sps:$4 sm:$0xff]  }
 0x146   :  { %v175_v30 = vmul.f32 0.125, %v174_v29  ;;  %v176_v31 = vmul.f32 %v166_v28, %v166_v28  ;;  %v178_v39 = vsub.f32 %v152_v10, %v166_v28  ;;  %v683_v28 = vld [vmem:[#allocation10 + $0x20] ss:$8 sps:$4 sm:$0xff]   ;;  %v684_v29 = vld [vmem:[#allocation10 + $0x34] ss:$8 sps:$4 sm:$0xff]  }
 0x147   :  { %519 = vmatpush1.bf16.msra.mxu1 %v680_v26 }
 0x148   :  { %v177_v32 = vsub.f32 %v175_v30, %v176_v31  ;;  %520 = vmatprep.subr.bf16.mxu1 %v681_v27  ;;  %v686_v30 = vld [vmem:[#allocation10 + $0x30] ss:$8 sps:$4 sm:$0xff]   ;;  %v687_v31 = vld [vmem:[#allocation10 + $0x44] ss:$8 sps:$4 sm:$0xff]  }
 0x14a   :  { %v179_v34 = vadd.f32 1e-05, %v177_v32  ;;  %v689_v32 = vld [vmem:[#allocation10 + $0x40] ss:$8 sps:$4 sm:$0xff]  }
 0x14b   :  { %521 = vmatpush1.bf16.msra.mxu1 %v683_v28 }
 0x14c   :  { %699 = vrsqrt.f32 %v179_v34  ;;  %522 = vmatprep.subr.bf16.mxu1 %v684_v29  ;;  %v692_v34 = vld [vmem:[#allocation10 + $0x50] ss:$8 sps:$4 sm:$0xff]  }
 0x14f   :  { %523 = vmatpush1.bf16.msra.mxu1 %v686_v30 }
 0x150   :  { %524 = vmatprep.subr.bf16.mxu1 %v687_v31 }
 0x153   :  { %525 = vmatpush1.bf16.msra.mxu1 %v689_v32 }
 0x154   :  { %526 = vmatprep.subr.bf16.mxu1 %v690_v33 }
 0x156   :  { %v700_v41 = vpop.eup %699 }
 0x157   :  { %v181_v42 = vmul.f32 %v700_v41, %v178_v39  ;;  %527 = vmatpush1.bf16.msra.mxu1 %v692_v34  ;;  %v696_v39 = vld [vmem:[#allocation10 + $0x74] ss:$8 sps:$4 sm:$0xff]   ;;  %v698_v41 = vld [vmem:[#allocation10 + $0x70] ss:$8 sps:$4 sm:$0xff]  }
 0x158   :  { %528 = vmatprep.subr.bf16.mxu1 %v693_v36 }
 0x159   :  { %v186_v44 = vmul.f32 %v185_v40, %v181_v42  ;;  %v860_v40 = vmov 0  }
 0x15a   :  { %548 = vmatprep.mubr.bf16.mxu1 %v860_v40 }
 0x15b   :  { %v191_v45 = vadd.f32 %v190_v43, %v186_v44  ;;  %529 = vmatpush1.bf16.msra.mxu1 %v695_v38 }
 0x15c   :  { %530 = vmatprep.subr.bf16.mxu1 %v696_v39 }
 0x15d   :  { %v192_v46 = vmax.f32 %v191_v45, 0.0 }
 0x15f   :  { %v193_v47 = vpack.c.bf16 %v192_v46, %v192_v46  ;;  %531 = vmatpush1.bf16.msra.mxu1 %v698_v41 }
 0x161   :  { %637 = vmatmul.mubr.msk.bf16.vlgmr.msra.gmra.mrb[4].mxu0 %vm158_vm3, %v193_v47 }
 0x162   :  { %648 = vmatprep.mubr.msk.bf16.mxu0 %vm859_vm0, %v858_v0  ;;  %641 = vmatpush3.bf16.msra.mxu0 %v671_v48 }
 0x163   :  { %642 = vmatprep.subr.bf16.mxu0 %v858_v0 }
 0x166   :  { %643 = vmatpush3.bf16.msra.mxu0 %v672_v49 }
 0x167   :  { %644 = vmatprep.subr.bf16.mxu0 %v858_v0 }
 0x16a   :  { %645 = vmatpush3.bf16.msra.mxu0 %v673_v50 }
 0x16b   :  { %646 = vmatprep.subr.bf16.mxu0 %v858_v0 }
 0x16e   :  { %647 = vmatpush3.bf16.msra.mxu0 %v674_v51 }
 0x234   :  { %v263_v52 = vpop.f32.mrb[4].mxu0 }
 0x235   :  { %v269_v53 = vsel %vm158_vm3, %v263_v52, 0.0  ;;  %v277_v54 = vmul.f32 %v263_v52, %v263_v52  ;;  %v638_v55 = vpop.f32.mrb[5].mxu0 }
 0x236   :  { %v270_v56 = vrot.slane %v269_v53, 4  ;;  %v266_v57 = vpop.f32.mrb[6].mxu0 }
 0x237   :  { %v278_v58 = vsel %vm158_vm3, %v277_v54, 0.0  ;;  %v639_v59 = vpop.f32.mrb[7].mxu0 }
 0x238   :  { %v271_v60 = vadd.f32 %v270_v56, %v269_v53  ;;  %v279_v61 = vrot.slane %v278_v58, 4 }
 0x23a   :  { %v272_v62 = vrot.slane %v271_v60, 2  ;;  %v280_v63 = vadd.f32 %v279_v61, %v278_v58 }
 0x23c   :  { %v273_v1 = vadd.f32 %v272_v62, %v271_v60  ;;  %v281_v2 = vrot.slane %v280_v63, 2 }
 0x23e   :  { %v274_v3 = vrot.slane %v273_v1, 1  ;;  %v282_v0 = vadd.f32 %v281_v2, %v280_v63  ;;  %v407_v2 = vsub.s32 5, %v979_v35 }
 0x240   :  { %v275_v4 = vadd.f32 %v274_v3, %v273_v1  ;;  %v283_v5 = vrot.slane %v282_v0, 1  ;;  %v402_v1 = vsub.s32 4, %v979_v35 }
 0x242   :  { %v276_v6 = vmul.f32 0.125, %v275_v4  ;;  %v284_v7 = vadd.f32 %v283_v5, %v282_v0  ;;  %v403_v0 = vrot.slane %v985_v37, %v402_v1 }
 0x244   :  { %v285_v8 = vmul.f32 0.125, %v284_v7  ;;  %v286_v9 = vmul.f32 %v276_v6, %v276_v6  ;;  %v288_v14 = vsub.f32 %v263_v52, %v276_v6  ;;  %v408_v6 = vrot.slane %v985_v37, %v407_v2 }
 0x246   :  { %v287_v10 = vsub.f32 %v285_v8, %v286_v9 }
 0x248   :  { %v289_v11 = vadd.f32 1e-05, %v287_v10 }
 0x24a   :  { %701 = vrsqrt.f32 %v289_v11  ;;  %v430_v11 = vsub.s32 6, %v979_v35 }
 0x24c   :  { %v431_v13 = vrot.slane %v985_v37, %v430_v11 }
 0x254   :  { %v702_v16 = vpop.eup %701 }
 0x255   :  { %v291_v17 = vmul.f32 %v702_v16, %v288_v14  ;;  %v435_v14 = vrot.slane %v92_v12, %v430_v11 }
 0x257   :  { %v296_v19 = vmul.f32 %v295_v15, %v291_v17 }
 0x259   :  { %v301_v20 = vadd.f32 %v300_v18, %v296_v19 }
 0x25b   :  { %v302_v21 = vmax.f32 %v301_v20, 0.0 }
 0x25d   :  { %v303_v22 = vpack.c.bf16 %v302_v21, %v302_v21 }
 0x25f   :  { %649 = vmatmul.mubr.msk.bf16.vlgmr.msra.gmra.mrb[8].mxu0 %vm158_vm3, %v303_v22 }
 0x332   :  { %v373_v42 = vpop.f32.mrb[8].mxu0 }
 0x333   :  { %v379_v43 = vrot.slane %v373_v42, 4  ;;  %v386_v44 = vmul.f32 %v373_v42, %v373_v42  ;;  %v650_v45 = vpop.f32.mrb[9].mxu0 }
 0x334   :  { %v376_v46 = vpop.f32.mrb[10].mxu0 }
 0x335   :  { %v380_v47 = vadd.f32 %v379_v43, %v373_v42  ;;  %v387_v48 = vrot.slane %v386_v44, 4  ;;  %v651_v49 = vpop.f32.mrb[11].mxu0 }
 0x337   :  { %v381_v50 = vrot.slane %v380_v47, 2  ;;  %v388_v51 = vadd.f32 %v387_v48, %v386_v44 }
 0x339   :  { %v382_v52 = vadd.f32 %v381_v50, %v380_v47  ;;  %v389_v53 = vrot.slane %v388_v51, 2 }
 0x33b   :  { %v383_v54 = vrot.slane %v382_v52, 1  ;;  %v390_v55 = vadd.f32 %v389_v53, %v388_v51 }
 0x33d   :  { %v384_v56 = vadd.f32 %v383_v54, %v382_v52  ;;  %v391_v57 = vrot.slane %v390_v55, 1 }
 0x33f   :  { %v385_v58 = vmul.f32 0.125, %v384_v56  ;;  %v392_v59 = vadd.f32 %v391_v57, %v390_v55 }
 0x341   :  { %v393_v60 = vmul.f32 0.125, %v392_v59  ;;  %v394_v61 = vmul.f32 %v385_v58, %v385_v58  ;;  %v396_v3 = vsub.f32 %v373_v42, %v385_v58 }
 0x343   :  { %v395_v62 = vsub.f32 %v393_v60, %v394_v61 }
 0x345   :  { %v397_v63 = vadd.f32 1e-05, %v395_v62 }
 0x347   :  { %703 = vrsqrt.f32 %v397_v63 }
 0x351   :  { %v704_v4 = vpop.eup %703 }
 0x352   :  { %v399_v5 = vmul.f32 %v704_v4, %v396_v3 }
 0x354   :  { %v404_v7 = vmul.f32 %v403_v0, %v399_v5 }
 0x356   :  { %v409_v8 = vadd.f32 %v408_v6, %v404_v7 }
 0x358   :  { %v410_v9 = vmax.f32 %v409_v8, 0.0 }
 0x35a   :  { %v411_v10 = vpack.c.bf16 %v410_v9, %v410_v9 }
 0x35c   :  { %549 = vmatmul.mubr.bf16.vlgmr.msra.gmra.mrb[0].mxu1 %v411_v10 }
 0x42f   :  { %v550_v15 = vpop.f32.mrb[0].mxu1 }
 0x430   :  { %v551_v16 = vadd.f32 %v550_v15, %v431_v13  ;;  %v552_v17 = vpop.f32.mrb[1].mxu1 }
 0x431   :  { %v553_v18 = vadd.f32 %v552_v17, %v435_v14  ;;  %v554_v19 = vpop.f32.mrb[2].mxu1 }
 0x432   :  { %705 = vtanh.f32 %v551_v16  ;;  %v555_v20 = vpop.f32.mrb[3].mxu1 }
 0x433   :  { %707 = vtanh.f32 %v553_v18 }
 0x43c   :  { %v706_v21 = vpop.eup %705 }
 0x43d   :  { %v708_v35 = vpop.eup %707  ;;  %559 = vst [vmem:[#allocation11] sm:$0xff] %v706_v21 }
 0x43e   :  { %560 = vst [vmem:[#allocation11 + $0x8] sm:$0xff] %v708_v35 }
 0x43f   :  { %830 = shalt.err (!%p827_p2)
}
 0x440   :  { %s831_s17 = scalar_lea.hbm %s1030_s6, 256 }
 0x441   :  { %p832_p3 = scmp.ne.s32.totalorder %s1030_s6, %s831_s17  ;;  %p835_p4 = scmp.lt.u32.totalorder %s831_s17, %s1030_s6 }
 0x443   :  { %p837_p5 = pnand %p835_p4, %p832_p3 }
 0x445   :  { %840 = shalt.err (!%p837_p5)
}
 0x446   :  { %570 = dma.vmem_to_hbm [thread:$0]  %s568_s13, 256, %s1030_s6, [#allocation4]  }
 0x447   :  { %847 = dma.done.wait [#allocation4], 256  }
 0x448   :  { %848 = vsyncadd [#allocation4], 4294967040 }
 0x449   :  { %574 = vsyncpa [#allocation3], 1 }
 0x44a   :  { %575 = vsyncpa [#allocation6], 1 }
 0x44b   :  { %576 = vsyncpa [#allocation9], 1 }
 0x44c   :  { %577 = vsyncpa [#allocation4], 1 }

</bundles_post_ra>
